<compile_context>
chip_gen: v7x
topology: tpu7x:2x2x1
jax: 0.10.0
libtpu: 0.0.40
codegen_flags: <defaults>
</compile_context>

<pallas_src>
import jax
import jax.numpy as jnp
from jax import lax
from jax.experimental import pallas as pl
from jax.experimental.pallas import tpu as pltpu


_NL_PAD = 128                              # lane-dense padded class dimension
_VMEM_LIMIT_BYTES = 48 * 1024 * 1024       # < 64 MiB physical on v7x; ample on v5e/v6e


# ----------------------------- Pallas kernel ------------------------------- #
def _head_kernel(h_ref, w_ref, b_ref, o_ref):
    """sigmoid(hidden) @ W + b for one row tile, with fused 2-class NLL.

    h_ref: (TS, H)       bf16   hidden-state rows
    w_ref: (H, NL_PAD)   bf16   classifier weight, zero-padded to 128 columns
    b_ref: (1, NL_PAD)   f32    classifier bias, zero-padded
    o_ref: (TS, NL_PAD)  bf16   cols 0:2 = logits, col 2 = NLL(label==0),
                                col 3 = NLL(label==1), cols 4: = 0
    """
    s = jax.nn.sigmoid(h_ref[...])                      # bf16 EUP; MXU operand
    logits = jnp.dot(s, w_ref[...], preferred_element_type=jnp.float32)
    logits = logits + b_ref[...]                        # (TS, NL_PAD) f32

    # Fused 2-class cross-entropy (num_labels = 2, hardcoded as in the module).
    l0 = logits[:, 0:1]
    l1 = logits[:, 1:2]
    m = jnp.maximum(l0, l1)
    lse = m + jnp.log(jnp.exp(l0 - m) + jnp.exp(l1 - m))   # (TS, 1) f32

    # Pack per-row NLLs into spare lanes of the dense output block (no extra
    # output stream, no masked narrow stores, no label DMA into the kernel).
    col = lax.broadcasted_iota(jnp.int32, (1, o_ref.shape[1]), 1)
    out = jnp.where(col == 2, lse - l0, logits)         # NLL if label == 0
    out = jnp.where(col == 3, lse - l1, out)            # NLL if label == 1
    o_ref[...] = out.astype(o_ref.dtype)


# ------------------------------ Host wrapper ------------------------------- #
def _round_up(x, m):
    return (x + m - 1) // m * m


def _choose_row_tile(n_rows, hidden_size, itemsize, budget_bytes=24 * 1024 * 1024):
    """Largest row tile (multiple of 128, capped at 1024) whose double-buffered
    bf16 input fits the budget; small inputs collapse to a single exact tile."""
    max_ts = budget_bytes // (2 * hidden_size * itemsize)
    max_ts = max(128, (max_ts // 128) * 128)
    ts = min(1024, max_ts)
    if n_rows <= ts:
        ts = _round_up(max(n_rows, 1), 8)   # single tile, (near-)exact coverage
    return ts


def classifier_head(hidden_states, weight_t, bias, labels=None):
    """hidden_states: [B, S, H] bf16; weight_t: [H, NL] bf16; bias: [NL] f32.

    Returns (logits [B, S, NL] bf16, mean_loss or None).
    """
    B, S, H = hidden_states.shape
    NL = weight_t.shape[1]                  # = 2 for this module
    rows = B * S
    h2 = hidden_states.reshape(rows, H)

    # Lane-dense classifier: pad the (tiny) weight/bias to 128 output columns.
    # This touches only H*128 elements (constant-folded under jit), never the
    # large activation stream (the old jnp.pad of h2 is gone).
    w_pad = jnp.zeros((H, _NL_PAD), weight_t.dtype).at[:, :NL].set(weight_t)
    b_pad = jnp.zeros((1, _NL_PAD), jnp.float32).at[0, :NL].set(
        bias.astype(jnp.float32))

    ts = _choose_row_tile(rows, H, jnp.dtype(hidden_states.dtype).itemsize)
    grid = (pl.cdiv(rows, ts),)             # ragged tail handled by OOB semantics

    out = pl.pallas_call(
        _head_kernel,
        out_shape=jax.ShapeDtypeStruct((rows, _NL_PAD), jnp.bfloat16),
        grid_spec=pltpu.PrefetchScalarGridSpec(
            num_scalar_prefetch=0,
            grid=grid,
            in_specs=[
                pl.BlockSpec((ts, H), lambda i: (i, 0)),        # streamed rows
                pl.BlockSpec((H, _NL_PAD), lambda i: (0, 0)),   # resident weight
                pl.BlockSpec((1, _NL_PAD), lambda i: (0, 0)),   # resident bias
            ],
            out_specs=pl.BlockSpec((ts, _NL_PAD), lambda i: (i, 0)),
        ),
        compiler_params=pltpu.CompilerParams(
            dimension_semantics=("parallel",),                   # megacore on v7x
            vmem_limit_bytes=_VMEM_LIMIT_BYTES,
        ),
    )(h2, w_pad, b_pad)

    logits = out[:, :NL].reshape(B, S, NL)
    if labels is None:
        return logits, None

    # Tiny label-dependent select + mean on (rows,) vectors, outside the kernel.
    nll01 = out[:, NL:NL + 2].astype(jnp.float32)       # (rows, 2)
    lbl = labels.reshape(rows).astype(jnp.int32)
    # TODO(synk): CrossEntropyLoss would raise on labels outside [0, 2); here
    # they fall into the label==1 branch.  attention_mask / ignore_index are
    # not applied, matching the reference forward().
    nll = jnp.where(lbl == 0, nll01[:, 0], nll01[:, 1])
    loss = jnp.mean(nll)
    return logits, loss


# ------------------------- Module-level wrapper ---------------------------- #
class LlamaModelForBinaryRegressionPallas:
    """Synthetic, deterministic stand-in for the PyTorch module."""

    def __init__(self, key, vocab_size=128, hidden_size=32, num_labels=2):
        self.num_labels = num_labels
        self.hidden_size = hidden_size
        k_emb, k_w, k_b = jax.random.split(key, 3)
        # TODO(synk): the pretrained Llama backbone (AutoModel + LoRA / 4-bit
        # quant + flash-attention-2) is replaced by a deterministic embedding
        # table standing in for `last_hidden_state`.
        self.embed = (
            jax.random.normal(k_emb, (vocab_size, hidden_size), jnp.float32) * 0.5
        ).astype(jnp.bfloat16)
        # classifier: nn.Linear(hidden_size, num_labels), stored transposed.
        self.w_t = (
            jax.random.normal(k_w, (hidden_size, num_labels), jnp.float32)
            / jnp.sqrt(hidden_size)
        ).astype(jnp.bfloat16)
        self.b = jax.random.normal(k_b, (num_labels,), jnp.float32) * 0.01

    def __call__(self, input_ids, attention_mask=None, labels=None):
        # "backbone": embedding lookup -> last_hidden_state [B, S, H]
        # TODO(synk): for the synthetic path the gather could be fused into the
        # kernel (scalar-prefetched ids + pl.Element index_map on the table);
        # skipped since a real backbone hands over hidden_states already in HBM.
        hidden_states = jnp.take(self.embed, input_ids, axis=0)
        logits, loss = classifier_head(hidden_states, self.w_t, self.b, labels)
        if labels is not None:
            return {"loss": loss, "logits": logits}
        return {"logits": logits}


# --------------------------------- Main ------------------------------------ #
if __name__ == "__main__":
    key = jax.random.PRNGKey(0)
    k_model, k_ids, k_lbl = jax.random.split(key, 3)

    B, S, H, V = 2, 8, 32, 128
    model = LlamaModelForBinaryRegressionPallas(
        k_model, vocab_size=V, hidden_size=H, num_labels=2
    )

    input_ids = jax.random.randint(k_ids, (B, S), 0, V, dtype=jnp.int32)
    attention_mask = jnp.ones((B, S), dtype=jnp.int32)
    labels = jax.random.randint(k_lbl, (B, S), 0, 2, dtype=jnp.int32)

    out = model(input_ids, attention_mask=attention_mask, labels=labels)
    logits = jax.block_until_ready(out["logits"])
    loss = jax.block_until_ready(out["loss"])

    # plain-JAX reference (f32 math)
    hs = jnp.take(model.embed, input_ids, axis=0).astype(jnp.float32)
    ref_f32 = jnp.dot(jax.nn.sigmoid(hs), model.w_t.astype(jnp.float32)) + model.b
    ref_logits = ref_f32.astype(jnp.bfloat16)
    flat = ref_f32.reshape(-1, 2)
    logz = jax.nn.logsumexp(flat, axis=-1)
    picked = jnp.take_along_axis(flat, labels.reshape(-1, 1), axis=-1)[:, 0]
    ref_loss = jnp.mean(logz - picked)

    assert logits.shape == (B, S, 2) and logits.dtype == jnp.bfloat16
    assert jnp.allclose(
        logits.astype(jnp.float32), ref_logits.astype(jnp.float32),
        atol=2e-2, rtol=2e-2,
    )
    assert jnp.isfinite(loss)
    assert abs(float(loss) - float(ref_loss)) < 5e-2

    # also exercise the no-labels (inference) path
    out_inf = model(input_ids, attention_mask=attention_mask)
    jax.block_until_ready(out_inf["logits"])
    assert out_inf["logits"].shape == (B, S, 2)

    print("KERNEL_OK")
</pallas_src>

<mosaic_0001>
module attributes {stable_mosaic.version = 11 : i64} {
  func.func @_head_kernel(%arg0: i32, %arg1: memref<16x32xbf16, #tpu.memory_space<vmem>>, %arg2: memref<32x128xbf16, #tpu.memory_space<vmem>>, %arg3: memref<1x128xf32, #tpu.memory_space<vmem>>, %arg4: memref<16x128xbf16, #tpu.memory_space<vmem>>) attributes {dimension_semantics = [#tpu.dimension_semantics<parallel>], iteration_bounds = array<i64: 1>, scalar_prefetch = 0 : i64, scratch_operands = 0 : i64, tpu.core_type = #tpu.core_type<tc>, window_params = [{transform_indices = @transform_0, window_bounds = array<i64: 16, 32>}, {pipeline_mode = #tpu.pipeline_mode<synchronous>, transform_indices = @transform_1, window_bounds = array<i64: 32, 128>}, {pipeline_mode = #tpu.pipeline_mode<synchronous>, transform_indices = @transform_2, window_bounds = array<i64: 1, 128>}, {transform_indices = @transform_3, window_bounds = array<i64: 16, 128>}]} {
    %c0 = arith.constant 0 : index
    %c0_0 = arith.constant 0 : index
    %0 = vector.load %arg1[%c0, %c0_0] : memref<16x32xbf16, #tpu.memory_space<vmem>>, vector<16x32xbf16>
    %1 = arith.negf %0 : vector<16x32xbf16>
    %2 = math.exp %1 : vector<16x32xbf16>
    %cst = arith.constant 1.000000e+00 : bf16
    %3 = vector.broadcast %cst : bf16 to vector<16x32xbf16>
    %4 = arith.addf %3, %2 : vector<16x32xbf16>
    %5 = arith.divf %3, %4 : vector<16x32xbf16>
    %c0_1 = arith.constant 0 : index
    %c0_2 = arith.constant 0 : index
    %6 = vector.load %arg2[%c0_1, %c0_2] : memref<32x128xbf16, #tpu.memory_space<vmem>>, vector<32x128xbf16>
    %cst_3 = arith.constant dense<0.000000e+00> : vector<16x128xf32>
    %7 = tpu.matmul %5, %6, %cst_3 {dimension_numbers = #tpu.dot_dimension_numbers<[1], [0], [0], [1], [0, 0, 1, 1], [], []>} : vector<16x32xbf16>, vector<32x128xbf16>, vector<16x128xf32> -> vector<16x128xf32>
    %c0_4 = arith.constant 0 : index
    %c0_5 = arith.constant 0 : index
    %8 = vector.load %arg3[%c0_4, %c0_5] : memref<1x128xf32, #tpu.memory_space<vmem>>, vector<1x128xf32>
    %9 = vector.broadcast %8 : vector<1x128xf32> to vector<16x128xf32>
    %10 = arith.addf %7, %9 : vector<16x128xf32>
    %11 = vector.extract_strided_slice %10 {offsets = [0, 0], sizes = [16, 1], strides = [1, 1]} : vector<16x128xf32> to vector<16x1xf32>
    %12 = vector.extract_strided_slice %10 {offsets = [0, 1], sizes = [16, 1], strides = [1, 1]} : vector<16x128xf32> to vector<16x1xf32>
    %13 = arith.maximumf %11, %12 : vector<16x1xf32>
    %14 = arith.subf %11, %13 : vector<16x1xf32>
    %15 = math.exp %14 : vector<16x1xf32>
    %16 = arith.subf %12, %13 : vector<16x1xf32>
    %17 = math.exp %16 : vector<16x1xf32>
    %18 = arith.addf %15, %17 : vector<16x1xf32>
    %19 = math.log %18 : vector<16x1xf32>
    %20 = arith.addf %13, %19 : vector<16x1xf32>
    %21 = tpu.iota {dimensions = array<i32: 1>} : vector<1x128xi32>
    %c2_i32 = arith.constant 2 : i32
    %22 = vector.broadcast %c2_i32 : i32 to vector<1x128xi32>
    %23 = arith.cmpi eq, %21, %22 : vector<1x128xi32>
    %24 = arith.subf %20, %11 : vector<16x1xf32>
    %25 = vector.shape_cast %23 : vector<1x128xi1> to vector<1x128xi1>
    %26 = vector.broadcast %25 : vector<1x128xi1> to vector<16x128xi1>
    %27 = vector.shape_cast %24 : vector<16x1xf32> to vector<16x1xf32>
    %28 = vector.broadcast %27 : vector<16x1xf32> to vector<16x128xf32>
    %29 = arith.select %26, %28, %10 : vector<16x128xi1>, vector<16x128xf32>
    %c3_i32 = arith.constant 3 : i32
    %30 = vector.broadcast %c3_i32 : i32 to vector<1x128xi32>
    %31 = arith.cmpi eq, %21, %30 : vector<1x128xi32>
    %32 = arith.subf %20, %12 : vector<16x1xf32>
    %33 = vector.shape_cast %31 : vector<1x128xi1> to vector<1x128xi1>
    %34 = vector.broadcast %33 : vector<1x128xi1> to vector<16x128xi1>
    %35 = vector.shape_cast %32 : vector<16x1xf32> to vector<16x1xf32>
    %36 = vector.broadcast %35 : vector<16x1xf32> to vector<16x128xf32>
    %37 = arith.select %34, %36, %29 : vector<16x128xi1>, vector<16x128xf32>
    %38 = arith.truncf %37 : vector<16x128xf32> to vector<16x128xbf16>
    %c0_6 = arith.constant 0 : index
    %c0_7 = arith.constant 0 : index
    %39 = vector.load %arg4[%c0_6, %c0_7] : memref<16x128xbf16, #tpu.memory_space<vmem>>, vector<16x128xbf16>
    tpu.vector_store %arg4[%c0_6, %c0_7], %38 {strides = array<i32>} : memref<16x128xbf16, #tpu.memory_space<vmem>>, vector<16x128xbf16>,
    return
  }
  func.func @transform_0(%arg0: i32) -> (i32, i32) {
    %c0_i32 = arith.constant 0 : i32
    %c0_i32_0 = arith.constant 0 : i32
    return %arg0, %c0_i32 : i32, i32
  }
  func.func @transform_1(%arg0: i32) -> (i32, i32) {
    %c0_i32 = arith.constant 0 : i32
    %c0_i32_0 = arith.constant 0 : i32
    %c0_i32_1 = arith.constant 0 : i32
    return %c0_i32, %c0_i32_0 : i32, i32
  }
  func.func @transform_2(%arg0: i32) -> (i32, i32) {
    %c0_i32 = arith.constant 0 : i32
    %c0_i32_0 = arith.constant 0 : i32
    %c0_i32_1 = arith.constant 0 : i32
    return %c0_i32, %c0_i32_0 : i32, i32
  }
  func.func @transform_3(%arg0: i32) -> (i32, i32) {
    %c0_i32 = arith.constant 0 : i32
    %c0_i32_0 = arith.constant 0 : i32
    return %arg0, %c0_i32 : i32, i32
  }
}

</mosaic_0001>

<bundles_post_ra>
// kernel: tpu_custom_call.1
= control target key start
LH: loop header
LB: loop body
LE: loop exit
PB: predicated region body
PF: predicated region fallthrough
CT: control target
= control target key end

     0   :  { %8 = vsyncpa [#allocation3], 0  ;;  %s481_s0 = inlined_call_operand.hbm [shape: bf16[16,32], index: 0, kind: input, shape index: {}]   ;;  %s482_s1 = inlined_call_operand.hbm [shape: bf16[32,128], index: 1, kind: input, shape index: {}]   ;;  %s483_s2 = inlined_call_operand.vmem [shape: f32[1,128], index: 2, kind: input, shape index: {}]   ;;  %s484_s3 = inlined_call_operand.hbm [shape: bf16[16,128], index: 3, kind: output, shape index: {}]  }
   0x1   :  { %9 = vsyncpa [#allocation6], 0 }
   0x2   :  { %10 = vsyncpa [#allocation4], 0  ;;  %s387_s12 = smov [#allocation2]   ;;  %s315_s16 = scalar_lea.hbm %s481_s0, 128 }
   0x3   :  { %s16_s13 = sshll.u32 %s387_s12, 4  ;;  %p316_p0 = scmp.ne.s32.totalorder %s481_s0, %s315_s16  ;;  %s17_s13 = int_to_ptr.vmem [resolvable:$true] %s16_s13 }
   0x4   :  { %p319_p1 = scmp.lt.u32.totalorder %s315_s16, %s481_s0 }
   0x6   :  { %p321_p2 = pnand %p319_p1, %p316_p0 }
   0x8   :  { %324 = shalt.err (!%p321_p2)
}
   0x9   :  { %s325_s21 = scalar_lea.vmem %s17_s13, 128  ;;  %p330_p4 = scmp.lt.s32.totalorder %s17_s13, %s17_s13 }
   0xa   :  { %p326_p3 = scmp.ne.s32.totalorder %s17_s13, %s325_s21  ;;  %p331_p5 = scmp.lt.s32.totalorder %s325_s21, %s325_s21 }
   0xc   :  { %p332_p6 = por %p331_p5, %p330_p4 }
   0xe   :  { %p333_p7 = pnand %p332_p6, %p326_p3 }
  0x10   :  { %336 = shalt.err (!%p333_p7)
}
  0x11   :  { %s388_s22 = smov 64   ;;  %s389_s23 = smov 4  }
  0x12   :  { %22 = dma.hbm_to_vmem [thread:$0]  %s481_s0, 128, %s17_s13, [#allocation3], %s388_s22, %s388_s22, %s389_s23  }
  0x13   :  { %s390_s26 = smov [#allocation5]   ;;  %s337_s30 = scalar_lea.hbm %s482_s1, 256 }
  0x14   :  { %s28_s27 = sshll.u32 %s390_s26, 4  ;;  %p338_p8 = scmp.ne.s32.totalorder %s482_s1, %s337_s30  ;;  %s29_s27 = int_to_ptr.vmem [resolvable:$true] %s28_s27 }
  0x15   :  { %p341_p9 = scmp.lt.u32.totalorder %s337_s30, %s482_s1 }
  0x17   :  { %p343_p10 = pnand %p341_p9, %p338_p8 }
  0x19   :  { %346 = shalt.err (!%p343_p10)
}
  0x1a   :  { %s347_s8 = scalar_lea.vmem %s29_s27, 256  ;;  %p352_p12 = scmp.lt.s32.totalorder %s29_s27, %s29_s27 }
  0x1b   :  { %p348_p11 = scmp.ne.s32.totalorder %s29_s27, %s347_s8  ;;  %p353_p13 = scmp.lt.s32.totalorder %s347_s8, %s347_s8 }
  0x1d   :  { %p354_p0 = por %p353_p13, %p352_p12 }
  0x1f   :  { %p355_p1 = pnand %p354_p0, %p348_p11 }
  0x21   :  { %358 = shalt.err (!%p355_p1)
}
  0x22   :  { %34 = dma.hbm_to_vmem [thread:$0]  %s482_s1, 256, %s29_s27, [#allocation6], %s388_s22, %s388_s22, %s389_s23  }
  0x23   :  { %381 = dma.done.wait [#allocation3], 128  }
  0x24   :  { %382 = vsyncadd [#allocation3], 4294967168 }
  0x25   :  { %383 = dma.done.wait [#allocation6], 256  }
  0x26   :  { %384 = vsyncadd [#allocation6], 4294967040  ;;  %v391_v0 = vmov 0.0   ;;  %vm392_vm0 = vmmov 0   ;;  %v293_v1 = vld [vmem:[#allocation5] sm:$0xff]   ;;  %v294_v2 = vld [vmem:[#allocation5 + $0x8] sm:$0xff]   ;;  %v180_v58 = vlaneseq }
  0x27   :  { %263 = vmatprep.subr.bf16.mxu0 %v391_v0  ;;  %267 = vmatprep.mubr.msk.bf16.mxu0 %vm392_vm0, %v391_v0  ;;  %v45_v3 = vld [vmem:[#allocation2] sm:$0xf]  ;;  %v46_v4 = vld [vmem:[#allocation2 + $0x4] sm:$0xf]  ;;  %vm89_vm1 = vcmask 261120   ;;  %s393_s11 = smov 127  }
  0x28   :  { %264 = vmatpush3.bf16.msra.mxu0 %v293_v1  ;;  %v244_v5 = vmul.bf16 3216621497, %v45_v3  ;;  %v245_v6 = vmul.bf16 3216621497, %v46_v4  ;;  %v246_v16 = vld [vmem:[%s483_s2] ss:$0 sm:$0xff] }
  0x29   :  { %265 = vmatprep.subr.bf16.mxu0 %v391_v0  ;;  %s394_s12 = smov 1   ;;  %v395_v35 = vmov 0   ;;  %v181_v59 = vand.u32 127, %v180_v58  ;;  %s396_s2 = smov [#allocation7]  }
  0x2a   :  { %295 = vpow.bf16 %v244_v5  ;;  %287 = vset.pattern.permute.xlu1 %v395_v35  ;;  %281 = vset.pattern.permute.xlu0 %v395_v35  ;;  %s231_s13 = sshll.u32 %s396_s2, 4  ;;  %s232_s13 = int_to_ptr.vmem [resolvable:$true] %s231_s13 }
  0x2b   :  { %297 = vpow.bf16 %v245_v6  ;;  %vm182_vm2 = vcmp.eq.s32.totalorder %v181_v59, 2  ;;  %vm199_vm3 = vcmp.eq.s32.totalorder %v181_v59, 3  ;;  %s359_s14 = scalar_lea.vmem %s232_s13, 128  ;;  %p364_p3 = scmp.lt.s32.totalorder %s232_s13, %s232_s13 }
  0x2c   :  { %266 = vmatpush3.bf16.msra.mxu0 %v294_v2  ;;  %p360_p2 = scmp.ne.s32.totalorder %s232_s13, %s359_s14  ;;  %p365_p4 = scmp.lt.s32.totalorder %s359_s14, %s359_s14 }
  0x2e   :  { %p366_p5 = por %p365_p4, %p364_p3 }
  0x30   :  { %p367_p6 = pnand %p366_p5, %p360_p2 }
  0x35   :  { %v296_v7 = vpop.eup %295 }
  0x36   :  { %v298_v8 = vpop.eup %297  ;;  %v55_v9 = vadd.bf16 1065369472, %v296_v7 }
  0x37   :  { %v56_v10 = vadd.bf16 1065369472, %v298_v8 }
  0x38   :  { %299 = vrcp.bf16 %v55_v9 }
  0x39   :  { %301 = vrcp.bf16 %v56_v10 }
  0x43   :  { %v300_v11 = vpop.eup %299 }
  0x44   :  { %v302_v12 = vpop.eup %301  ;;  %v58_v13 = vmul.bf16 1065369472, %v300_v11 }
  0x45   :  { %v60_v14 = vmul.bf16 1065369472, %v302_v12 }
  0x47   :  { %v247_v15 = vcombine.low %v58_v13, %v60_v14 }
  0x49   :  { %268 = vmatmul.mubr.msk.bf16.vlgmr.msra.gmra.mrb[0].mxu0 %vm89_vm1, %v247_v15 }
 0x11c   :  { %v127_v17 = vpop.f32.mrb[0].mxu0 }
 0x11d   :  { %v450_v18 = vadd.f32 %v246_v16, %v127_v17  ;;  %v269_v19 = vpop.f32.mrb[1].mxu0 }
 0x11e   :  { %v130_v20 = vpop.f32.mrb[2].mxu0 }
 0x11f   :  { %136 = vrot.lane.b32.xlu0 %v450_v18, %s393_s11  ;;  %v270_v21 = vpop.f32.mrb[3].mxu0  ;;  %v453_v22 = vadd.f32 %v246_v16, %v130_v20 }
 0x123   :  { %138 = vrot.lane.b32.xlu0 %v453_v22, %s393_s11 }
 0x191   :  { %v137_v23 = vpop.permute.xlu0 %136 }
 0x192   :  { %v142_v24 = vmax.f32 %v450_v18, %v137_v23 }
 0x194   :  { %152 = vrot.lane.b32.xlu1 %v142_v24, %s394_s12  ;;  %v144_v36 = vsub.f32 %v450_v18, %v142_v24 }
 0x195   :  { %v139_v25 = vpop.permute.xlu0 %138 }
 0x196   :  { %v143_v26 = vmax.f32 %v453_v22, %v139_v25  ;;  %v146_v37 = vmul.f32 1.442695, %v144_v36 }
 0x198   :  { %154 = vrot.lane.b32.xlu1 %v143_v26, %s394_s12  ;;  %v145_v38 = vsub.f32 %v453_v22, %v143_v26 }
 0x19a   :  { %v148_v39 = vmul.f32 1.442695, %v145_v38 }
 0x206   :  { %v153_v27 = vpop.permute.xlu1 %152 }
 0x207   :  { %v158_v28 = vsub.f32 %v450_v18, %v153_v27 }
 0x209   :  { %v160_v29 = vmul.f32 1.442695, %v158_v28 }
 0x20a   :  { %v155_v30 = vpop.permute.xlu1 %154 }
 0x20b   :  { %303 = vpow2.f32 %v160_v29  ;;  %v159_v31 = vsub.f32 %v453_v22, %v155_v30 }
 0x20d   :  { %v162_v32 = vmul.f32 1.442695, %v159_v31 }
 0x20f   :  { %305 = vpow2.f32 %v162_v32 }
 0x210   :  { %307 = vpow2.f32 %v146_v37 }
 0x211   :  { %309 = vpow2.f32 %v148_v39 }
 0x215   :  { %v304_v33 = vpop.eup %303 }
 0x216   :  { %166 = vrot.lane.b32.xlu0 %v304_v33, %s393_s11 }
 0x219   :  { %v306_v34 = vpop.eup %305 }
 0x21a   :  { %168 = vrot.lane.b32.xlu1 %v306_v34, %s393_s11  ;;  %v308_v40 = vpop.eup %307 }
 0x21b   :  { %v310_v43 = vpop.eup %309 }
 0x288   :  { %v167_v41 = vpop.permute.xlu0 %166 }
 0x289   :  { %v172_v42 = vadd.f32 %v308_v40, %v167_v41 }
 0x28b   :  { %311 = vlog2.f32 %v172_v42 }
 0x28c   :  { %v169_v44 = vpop.permute.xlu1 %168 }
 0x28d   :  { %v173_v45 = vadd.f32 %v310_v43, %v169_v44 }
 0x28f   :  { %313 = vlog2.f32 %v173_v45 }
 0x295   :  { %v312_v46 = vpop.eup %311 }
 0x296   :  { %v175_v47 = vmul.f32 0.6931472, %v312_v46 }
 0x298   :  { %v178_v49 = vadd.f32 %v175_v47, %v142_v24 }
 0x299   :  { %v314_v48 = vpop.eup %313 }
 0x29a   :  { %v177_v50 = vmul.f32 0.6931472, %v314_v48  ;;  %v200_v52 = vsub.f32 %v178_v49, %v137_v23  ;;  %v183_v54 = vsub.f32 %v178_v49, %v450_v18 }
 0x29c   :  { %v179_v51 = vadd.f32 %v177_v50, %v143_v26 }
 0x29e   :  { %v201_v53 = vsub.f32 %v179_v51, %v139_v25  ;;  %v184_v55 = vsub.f32 %v179_v51, %v453_v22 }
 0x2a0   :  { %v288_v56 = vpack.i.bf16 %v201_v53, %v200_v52  ;;  %v282_v57 = vpack.i.bf16 %v184_v55, %v183_v54 }
 0x2a2   :  { %289 = vperm.xlu1 %287, %v288_v56   ;;  %283 = vperm.xlu0 %281, %v282_v57  }
 0x321   :  { %v290_v60 = vpop.permute.xlu1 %289  ;;  %v284_v61 = vpop.permute.xlu0 %283 }
 0x322   :  { %v292_v62 = vunpack.i.h.bf16 %v290_v60  ;;  %v291_v63 = vunpack.i.l.bf16 %v290_v60  ;;  %v286_v0 = vunpack.i.h.bf16 %v284_v61  ;;  %v285_v1 = vunpack.i.l.bf16 %v284_v61 }
 0x324   :  { %v198_v2 = vsel %vm182_vm2, %v286_v0, %v453_v22  ;;  %v197_v3 = vsel %vm182_vm2, %v285_v1, %v450_v18 }
 0x325   :  { %v214_v4 = vsel %vm199_vm3, %v291_v63, %v197_v3  ;;  %v215_v5 = vsel %vm199_vm3, %v292_v62, %v198_v2 }
 0x326   :  { %v258_v6 = vpack.c.bf16 %v215_v5, %v214_v4 }
 0x328   :  { %259 = vst [vmem:[#allocation7] sm:$0xff] %v258_v6  }
 0x329   :  { %370 = shalt.err (!%p367_p6)
}
 0x32a   :  { %s371_s17 = scalar_lea.hbm %s484_s3, 128 }
 0x32b   :  { %p372_p7 = scmp.ne.s32.totalorder %s484_s3, %s371_s17  ;;  %p375_p8 = scmp.lt.u32.totalorder %s371_s17, %s484_s3 }
 0x32d   :  { %p377_p9 = pnand %p375_p8, %p372_p7 }
 0x32f   :  { %380 = shalt.err (!%p377_p9)
}
 0x330   :  { %237 = dma.vmem_to_hbm [thread:$0]  %s232_s13, 128, %s484_s3, [#allocation4], %s388_s22, %s388_s22, %s389_s23  }
 0x331   :  { %385 = dma.done.wait [#allocation4], 128  }
 0x332   :  { %386 = vsyncadd [#allocation4], 4294967168 }
 0x333   :  { %241 = vsyncpa [#allocation3], 1 }
 0x334   :  { %242 = vsyncpa [#allocation6], 1 }
 0x335   :  { %243 = vsyncpa [#allocation4], 1 }

</bundles_post_ra>
